<compile_context>
chip_gen: v7x
topology: tpu7x:2x2x1
jax: 0.10.0
libtpu: 0.0.40
codegen_flags: <defaults>
</compile_context>

<pallas_src>
import functools

import jax
import jax.numpy as jnp
from jax import lax
from jax.experimental import pallas as pl
from jax.experimental.pallas import tpu as pltpu

_MASK_VALUE = -1e30  # finite "-inf": safe under online-LSE rescaling


def _round_up(x, m):
    return (x + m - 1) // m * m


def _vmem_limit_bytes(default=48 * 1024 * 1024):
    """Generation-aware VMEM limit (<=56 MiB on v7x, up to ~100 MiB on v5e/v6e)."""
    try:
        cap = int(pltpu.get_tpu_info().vmem_capacity_bytes)
        if cap >= 64 * 1024 * 1024:
            return min(cap - 8 * 1024 * 1024, 100 * 1024 * 1024)
    except Exception:
        pass
    return default


def _nt_xent_lse_kernel(zn_ref, znT_ref, lse_ref, m_ref, s_ref, *,
                        n_valid, n_pad_c, block_rows, block_cols):
    """One (TM, TN) similarity tile + online logsumexp over column strips."""
    i = pl.program_id(0)                 # row strip ("parallel")
    j = pl.program_id(1)                 # column strip ("arbitrary" reduction)
    last_j = pl.num_programs(1) - 1

    @pl.when(j == 0)
    def _init():
        m_ref[...] = jnp.full_like(m_ref, _MASK_VALUE)
        s_ref[...] = jnp.zeros_like(s_ref)

    # (TM, D) @ (D, TN) on the MXU; bf16/f32 operands, f32 accumulation.
    sim = jnp.dot(zn_ref[...], znT_ref[...],
                  preferred_element_type=jnp.float32)            # (TM, TN) f32

    # Mask the self-similarity (and zero-padded columns when present).
    col = j * block_cols + lax.broadcasted_iota(jnp.int32, sim.shape, 1)
    row = i * block_rows + lax.broadcasted_iota(jnp.int32, sim.shape, 0)
    masked = col == row
    if n_valid < n_pad_c:                                        # static branch
        masked = masked | (col >= n_valid)
    sim = jnp.where(masked, jnp.float32(_MASK_VALUE), sim)

    # Online logsumexp across column strips (running max / running sum).
    m_blk = jnp.max(sim, axis=1, keepdims=True)                  # (TM, 1)
    m_new = jnp.maximum(m_ref[...], m_blk)
    s_ref[...] = (s_ref[...] * jnp.exp(m_ref[...] - m_new)
                  + jnp.sum(jnp.exp(sim - m_new), axis=1, keepdims=True))
    m_ref[...] = m_new

    @pl.when(j == last_j)
    def _finalize():
        lse_ref[...] = m_ref[...] + jnp.log(s_ref[...])


def nt_xent_loss(z_i, z_j, temperature, *, operand_dtype=jnp.bfloat16):
    """Pallas implementation of NT_XentLoss.forward(z_i, z_j)."""
    assert z_i.shape == z_j.shape and z_i.ndim == 2
    B, D = z_i.shape
    N = 2 * B

    z = jnp.concatenate([z_i, z_j], axis=0).astype(jnp.float32)   # (N, D)

    # L2-normalize once and fold sqrt(1/temperature): zn @ zn.T == cos_sim/temp.
    # TODO(synk): torch clamps ||x||*||y|| at 1e-8; clamping each ||z||^2 at
    # 1e-8 is equivalent except for near-zero rows.
    sq = jnp.sum(z * z, axis=-1, keepdims=True)
    inv = lax.rsqrt(jnp.maximum(sq, jnp.float32(1e-8)))
    zn = z * (inv * jnp.float32(1.0 / (float(temperature) ** 0.5)))  # f32 (N, D)

    # Positive-pair (numerator) term in exact f32, O(N*D):
    #   sum_i sim[i, (i+B) mod N] == 2 * sum(zn[:B] * zn[B:])
    pos_sum = 2.0 * jnp.sum(zn[:B] * zn[B:])

    # ------------------------------ tiling -----------------------------------
    sub = 8 * (4 // jnp.dtype(operand_dtype).itemsize)   # sublane pack: 8 f32, 16 bf16
    if N >= 256 and N % 256 == 0:
        tm = 256
    elif N >= 128 and N % 128 == 0:
        tm = 128
    else:
        tm = _round_up(min(N, 256), sub)
    if N >= 512 and N % 512 == 0:
        tn = 512
    elif N >= 256 and N % 256 == 0:
        tn = 256
    else:
        tn = _round_up(min(N, 512), 128)

    n_pad_r = _round_up(N, tm)
    n_pad_c = _round_up(N, tn)
    d_pad = _round_up(D, 128)

    zn_lhs = jnp.pad(zn, ((0, n_pad_r - N), (0, d_pad - D))).astype(operand_dtype)
    zn_rhs = jnp.pad(zn, ((0, n_pad_c - N), (0, d_pad - D))).astype(operand_dtype).T

    grid = (n_pad_r // tm, n_pad_c // tn)
    kernel = functools.partial(
        _nt_xent_lse_kernel,
        n_valid=N, n_pad_c=n_pad_c, block_rows=tm, block_cols=tn)

    lse = pl.pallas_call(
        kernel,
        out_shape=jax.ShapeDtypeStruct((n_pad_r, 1), jnp.float32),
        grid=grid,
        in_specs=[
            pl.BlockSpec((tm, d_pad), lambda i, j: (i, 0)),   # LHS row strip
            pl.BlockSpec((d_pad, tn), lambda i, j: (0, j)),   # pre-transposed RHS
        ],
        out_specs=pl.BlockSpec((tm, 1), lambda i, j: (i, 0)),
        scratch_shapes=[pltpu.VMEM((tm, 1), jnp.float32),     # running max
                        pltpu.VMEM((tm, 1), jnp.float32)],    # running sum
        compiler_params=pltpu.CompilerParams(
            dimension_semantics=("parallel", "arbitrary"),
            vmem_limit_bytes=_vmem_limit_bytes()),
    )(zn_lhs, zn_rhs)

    loss = (jnp.sum(lse[:N, 0]) - pos_sum) / jnp.float32(N)
    return loss


def _reference_nt_xent(z_i, z_j, temperature):
    """Pure-JAX transcription of the PyTorch forward (for validation)."""
    B = z_i.shape[0]
    N = 2 * B
    z = jnp.concatenate([z_i, z_j], axis=0).astype(jnp.float32)
    norm = jnp.sqrt(jnp.sum(z * z, axis=-1, keepdims=True))
    sim = (z @ z.T) / jnp.maximum(norm * norm.T, 1e-8) / temperature
    sim_i_j = jnp.diag(sim, k=B)
    sim_j_i = jnp.diag(sim, k=-B)
    positive = jnp.concatenate([sim_i_j, sim_j_i]).reshape(N, 1)
    mask = ~(jnp.eye(N, dtype=bool)
             | jnp.eye(N, N, k=B, dtype=bool)
             | jnp.eye(N, N, k=-B, dtype=bool))
    negative = sim[mask].reshape(N, N - 2)
    logits = jnp.concatenate([positive, negative], axis=1)
    lse = jax.nn.logsumexp(logits, axis=1)
    loss = jnp.sum(lse - logits[:, 0])  # CE with labels==0, reduction='sum'
    return loss / N


if __name__ == "__main__":
    key = jax.random.PRNGKey(0)
    k1, k2 = jax.random.split(key)

    batch_size = 4
    hidden = 32
    temperature = 0.5

    z_i = jax.random.normal(k1, (batch_size, hidden), dtype=jnp.float32)
    z_j = jax.random.normal(k2, (batch_size, hidden), dtype=jnp.float32)

    ref = _reference_nt_xent(z_i, z_j, temperature)

    # Exactness check of the kernel logic with f32 MXU operands.
    loss_f32 = nt_xent_loss(z_i, z_j, temperature, operand_dtype=jnp.float32)
    jax.block_until_ready(loss_f32)
    assert jnp.allclose(loss_f32, ref, rtol=1e-4, atol=1e-4), (loss_f32, ref)

    # Fast path: bf16 MXU operands (full-rate MXU on v5e/v6e/v7x).
    loss_bf16 = nt_xent_loss(z_i, z_j, temperature)
    jax.block_until_ready(loss_bf16)
    assert jnp.allclose(loss_bf16, ref, rtol=3e-2, atol=3e-2), (loss_bf16, ref)

    print("KERNEL_OK")
</pallas_src>

<mosaic_0001>
module attributes {stable_mosaic.version = 11 : i64} {
  func.func @_nt_xent_lse_kernel(%arg0: i32, %arg1: i32, %arg2: memref<8x128xf32, #tpu.memory_space<vmem>>, %arg3: memref<128x128xf32, #tpu.memory_space<vmem>>, %arg4: memref<8x1xf32, #tpu.memory_space<vmem>>, %arg5: memref<8x1xf32, #tpu.memory_space<vmem>>, %arg6: memref<8x1xf32, #tpu.memory_space<vmem>>) attributes {dimension_semantics = [#tpu.dimension_semantics<parallel>, #tpu.dimension_semantics<arbitrary>], iteration_bounds = array<i64: 1, 1>, scalar_prefetch = 0 : i64, scratch_operands = 2 : i64, tpu.core_type = #tpu.core_type<tc>, window_params = [{transform_indices = @transform_0, window_bounds = array<i64: 8, 128>}, {transform_indices = @transform_1, window_bounds = array<i64: 128, 128>}, {transform_indices = @transform_2, window_bounds = array<i64: 8, 1>}]} {
    %c0_i32 = arith.constant 0 : i32
    %0 = arith.cmpi eq, %arg1, %c0_i32 : i32
    %1 = arith.extui %0 : i1 to i32
    %c0_i32_0 = arith.constant 0 : i32
    %2 = arith.cmpi ne, %1, %c0_i32_0 : i32
    scf.if %2 {
      %cst_20 = arith.constant -1.000000e+30 : f32
      %40 = vector.broadcast %cst_20 : f32 to vector<8x1xf32>
      %c0_21 = arith.constant 0 : index
      %c0_22 = arith.constant 0 : index
      %41 = vector.load %arg5[%c0_21, %c0_22] : memref<8x1xf32, #tpu.memory_space<vmem>>, vector<8x1xf32>
      tpu.vector_store %arg5[%c0_21, %c0_22], %40 {strides = array<i32>} : memref<8x1xf32, #tpu.memory_space<vmem>>, vector<8x1xf32>,
      %cst_23 = arith.constant 0.000000e+00 : f32
      %42 = vector.broadcast %cst_23 : f32 to vector<8x1xf32>
      %c0_24 = arith.constant 0 : index
      %c0_25 = arith.constant 0 : index
      %43 = vector.load %arg6[%c0_24, %c0_25] : memref<8x1xf32, #tpu.memory_space<vmem>>, vector<8x1xf32>
      tpu.vector_store %arg6[%c0_24, %c0_25], %42 {strides = array<i32>} : memref<8x1xf32, #tpu.memory_space<vmem>>, vector<8x1xf32>,
    } else {
    }
    %c0 = arith.constant 0 : index
    %c0_1 = arith.constant 0 : index
    %3 = vector.load %arg2[%c0, %c0_1] : memref<8x128xf32, #tpu.memory_space<vmem>>, vector<8x128xf32>
    %c0_2 = arith.constant 0 : index
    %c0_3 = arith.constant 0 : index
    %4 = vector.load %arg3[%c0_2, %c0_3] : memref<128x128xf32, #tpu.memory_space<vmem>>, vector<128x128xf32>
    %cst = arith.constant dense<0.000000e+00> : vector<8x128xf32>
    %5 = tpu.matmul %3, %4, %cst {dimension_numbers = #tpu.dot_dimension_numbers<[1], [0], [0], [1], [0, 0, 1, 1], [], []>} : vector<8x128xf32>, vector<128x128xf32>, vector<8x128xf32> -> vector<8x128xf32>
    %c128_i32 = arith.constant 128 : i32
    %6 = arith.muli %arg1, %c128_i32 : i32
    %7 = tpu.iota {dimensions = array<i32: 1>} : vector<8x128xi32>
    %8 = vector.broadcast %6 : i32 to vector<8x128xi32>
    %9 = arith.addi %8, %7 : vector<8x128xi32>
    %c8_i32 = arith.constant 8 : i32
    %10 = arith.muli %arg0, %c8_i32 : i32
    %11 = tpu.iota {dimensions = array<i32: 0>} : vector<8x128xi32>
    %12 = vector.broadcast %10 : i32 to vector<8x128xi32>
    %13 = arith.addi %12, %11 : vector<8x128xi32>
    %14 = arith.cmpi eq, %9, %13 : vector<8x128xi32>
    %c8_i32_4 = arith.constant 8 : i32
    %15 = vector.broadcast %c8_i32_4 : i32 to vector<8x128xi32>
    %16 = arith.cmpi sge, %9, %15 : vector<8x128xi32>
    %17 = arith.ori %14, %16 : vector<8x128xi1>
    %cst_5 = arith.constant -1.000000e+30 : f32
    %18 = vector.broadcast %cst_5 : f32 to vector<8x128xf32>
    %19 = arith.select %17, %18, %5 : vector<8x128xi1>, vector<8x128xf32>
    %cst_6 = arith.constant dense<0xFF800000> : vector<8xf32>
    %20 = vector.multi_reduction <maximumf>, %19, %cst_6 [1] : vector<8x128xf32> to vector<8xf32>
    %21 = vector.shape_cast %20 : vector<8xf32> to vector<8x1xf32>
    %c0_7 = arith.constant 0 : index
    %c0_8 = arith.constant 0 : index
    %22 = vector.load %arg5[%c0_7, %c0_8] : memref<8x1xf32, #tpu.memory_space<vmem>>, vector<8x1xf32>
    %23 = arith.maximumf %22, %21 : vector<8x1xf32>
    %c0_9 = arith.constant 0 : index
    %c0_10 = arith.constant 0 : index
    %24 = vector.load %arg6[%c0_9, %c0_10] : memref<8x1xf32, #tpu.memory_space<vmem>>, vector<8x1xf32>
    %c0_11 = arith.constant 0 : index
    %c0_12 = arith.constant 0 : index
    %25 = vector.load %arg5[%c0_11, %c0_12] : memref<8x1xf32, #tpu.memory_space<vmem>>, vector<8x1xf32>
    %26 = arith.subf %25, %23 : vector<8x1xf32>
    %27 = math.exp %26 : vector<8x1xf32>
    %28 = arith.mulf %24, %27 : vector<8x1xf32>
    %29 = vector.broadcast %23 : vector<8x1xf32> to vector<8x128xf32>
    %30 = arith.subf %19, %29 : vector<8x128xf32>
    %31 = math.exp %30 : vector<8x128xf32>
    %cst_13 = arith.constant dense<0.000000e+00> : vector<8xf32>
    %32 = vector.multi_reduction <add>, %31, %cst_13 [1] : vector<8x128xf32> to vector<8xf32>
    %33 = vector.shape_cast %32 : vector<8xf32> to vector<8x1xf32>
    %34 = arith.addf %28, %33 : vector<8x1xf32>
    %c0_14 = arith.constant 0 : index
    %c0_15 = arith.constant 0 : index
    %35 = vector.load %arg6[%c0_14, %c0_15] : memref<8x1xf32, #tpu.memory_space<vmem>>, vector<8x1xf32>
    tpu.vector_store %arg6[%c0_14, %c0_15], %34 {strides = array<i32>} : memref<8x1xf32, #tpu.memory_space<vmem>>, vector<8x1xf32>,
    %c0_16 = arith.constant 0 : index
    %c0_17 = arith.constant 0 : index
    %36 = vector.load %arg5[%c0_16, %c0_17] : memref<8x1xf32, #tpu.memory_space<vmem>>, vector<8x1xf32>
    tpu.vector_store %arg5[%c0_16, %c0_17], %23 {strides = array<i32>} : memref<8x1xf32, #tpu.memory_space<vmem>>, vector<8x1xf32>,
    %c0_i32_18 = arith.constant 0 : i32
    %37 = arith.cmpi eq, %arg1, %c0_i32_18 : i32
    %38 = arith.extui %37 : i1 to i32
    %c0_i32_19 = arith.constant 0 : i32
    %39 = arith.cmpi ne, %38, %c0_i32_19 : i32
    scf.if %39 {
      %c0_20 = arith.constant 0 : index
      %c0_21 = arith.constant 0 : index
      %40 = vector.load %arg5[%c0_20, %c0_21] : memref<8x1xf32, #tpu.memory_space<vmem>>, vector<8x1xf32>
      %c0_22 = arith.constant 0 : index
      %c0_23 = arith.constant 0 : index
      %41 = vector.load %arg6[%c0_22, %c0_23] : memref<8x1xf32, #tpu.memory_space<vmem>>, vector<8x1xf32>
      %42 = math.log %41 : vector<8x1xf32>
      %43 = arith.addf %40, %42 : vector<8x1xf32>
      %c0_24 = arith.constant 0 : index
      %c0_25 = arith.constant 0 : index
      %44 = vector.load %arg4[%c0_24, %c0_25] : memref<8x1xf32, #tpu.memory_space<vmem>>, vector<8x1xf32>
      tpu.vector_store %arg4[%c0_24, %c0_25], %43 {strides = array<i32>} : memref<8x1xf32, #tpu.memory_space<vmem>>, vector<8x1xf32>,
    } else {
    }
    return
  }
  func.func @transform_0(%arg0: i32, %arg1: i32) -> (i32, i32) {
    %c0_i32 = arith.constant 0 : i32
    %c0_i32_0 = arith.constant 0 : i32
    return %arg0, %c0_i32 : i32, i32
  }
  func.func @transform_1(%arg0: i32, %arg1: i32) -> (i32, i32) {
    %c0_i32 = arith.constant 0 : i32
    %c0_i32_0 = arith.constant 0 : i32
    return %c0_i32, %arg1 : i32, i32
  }
  func.func @transform_2(%arg0: i32, %arg1: i32) -> (i32, i32) {
    %c0_i32 = arith.constant 0 : i32
    %c0_i32_0 = arith.constant 0 : i32
    return %arg0, %c0_i32 : i32, i32
  }
}

</mosaic_0001>

<bundles_post_ra>
// kernel: tpu_custom_call.1
= control target key start
LH: loop header
LB: loop body
LE: loop exit
PB: predicated region body
PF: predicated region fallthrough
CT: control target
= control target key end

     0   :  { %7 = vsyncpa [#allocation5], 0  ;;  %s386_s0 = inlined_call_operand.hbm [shape: f32[8,128], index: 0, kind: input, shape index: {}]   ;;  %s387_s1 = inlined_call_operand.hbm [shape: f32[128,128], index: 1, kind: input, shape index: {}]   ;;  %s388_s2 = inlined_call_operand.vmem [shape: f32[8,1], index: 2, kind: output, shape index: {}]  }
   0x1   :  { %8 = vsyncpa [#allocation7], 0  ;;  %s323_s9 = smov [#allocation4]   ;;  %s324_s11 = smov [#allocation6]  }
   0x2   :  { %s15_s10 = sshll.u32 %s323_s9, 4  ;;  %s24_s12 = sshll.u32 %s324_s11, 4  ;;  %s16_s10 = int_to_ptr.vmem [resolvable:$true] %s15_s10  ;;  %s347_s12 = int_to_ptr.vmem [resolvable:$true] %s24_s12 }
   0x3   :  { %s275_s15 = scalar_lea.hbm %s386_s0, 128 }
   0x4   :  { %p276_p0 = scmp.ne.s32.totalorder %s386_s0, %s275_s15  ;;  %p279_p1 = scmp.lt.u32.totalorder %s275_s15, %s386_s0 }
   0x6   :  { %p281_p2 = pnand %p279_p1, %p276_p0 }
   0x8   :  { %284 = shalt.err (!%p281_p2)
}
   0x9   :  { %s285_s20 = scalar_lea.vmem %s16_s10, 128  ;;  %p290_p4 = scmp.lt.s32.totalorder %s16_s10, %s16_s10 }
   0xa   :  { %p286_p3 = scmp.ne.s32.totalorder %s16_s10, %s285_s20  ;;  %p291_p5 = scmp.lt.s32.totalorder %s285_s20, %s285_s20 }
   0xc   :  { %p292_p6 = por %p291_p5, %p290_p4 }
   0xe   :  { %p293_p7 = pnand %p292_p6, %p286_p3 }
  0x10   :  { %296 = shalt.err (!%p293_p7)
}
  0x11   :  { %18 = dma.hbm_to_vmem [thread:$0]  %s386_s0, 128, %s16_s10, [#allocation5]  }
  0x12   :  { %s297_s25 = scalar_lea.hbm %s387_s1, 2048 }
  0x13   :  { %p298_p8 = scmp.ne.s32.totalorder %s387_s1, %s297_s25  ;;  %p301_p9 = scmp.lt.u32.totalorder %s297_s25, %s387_s1 }
  0x15   :  { %p303_p10 = pnand %p301_p9, %p298_p8 }
  0x17   :  { %306 = shalt.err (!%p303_p10)
}
  0x18   :  { %s307_s30 = scalar_lea.vmem %s347_s12, 2048  ;;  %p312_p12 = scmp.lt.s32.totalorder %s347_s12, %s347_s12 }
  0x19   :  { %p308_p11 = scmp.ne.s32.totalorder %s347_s12, %s307_s30  ;;  %p313_p13 = scmp.lt.s32.totalorder %s307_s30, %s307_s30 }
  0x1b   :  { %p314_p0 = por %p313_p13, %p312_p12 }
  0x1d   :  { %p315_p1 = pnand %p314_p0, %p308_p11 }
  0x1f   :  { %318 = shalt.err (!%p315_p1)
}
  0x20   :  { %s325_s0 = smov 128   ;;  %s326_s3 = smov 8  }
  0x21   :  { %30 = dma.hbm_to_vmem [thread:$0]  %s387_s1, 2048, %s347_s12, [#allocation7], %s325_s0, %s325_s0, %s326_s3  }
  0x22   :  { %319 = dma.done.wait [#allocation5], 128  }
  0x23   :  { %320 = vsyncadd [#allocation5], 4294967168 }
  0x24   :  { %321 = dma.done.wait [#allocation7], 2048  }
  0x25   :  { %322 = vsyncadd [#allocation7], 4294965248  ;;  %vm41_vm0 = vcmask 7168   ;;  %v327_v0 = vmov 0.0|0.0   ;;  %v328_v1 = vmov 0.0   ;;  %vm329_vm1 = vmmov 0  }
  0x26   :  { %235 = vmatprep.subr.bf16.mxu0 %v327_v0  ;;  %43 = vst.msk [vmem:[#allocation3] sm:$0xff] %vm41_vm0, %v328_v1  ;;  %232 = vmatprep.mubr.msk.f32.mxu0 %vm329_vm1, %v328_v1  ;;  %v45_v2 = vld [vmem:[#allocation6] sm:$0xff]  ;;  %v46_v3 = vld [vmem:[#allocation6 + $0x8] sm:$0xff]  ;;  %v47_v4 = vld [vmem:[#allocation6 + $0x10] sm:$0xff]  ;;  %v330_v27 = vmov -1e+30   ;;  %v132_v28 = vlaneseq }
  0x27   :  { %v236_v5 = vpack.c.bf16 %v46_v3, %v45_v2  ;;  %v48_v6 = vld [vmem:[#allocation6 + $0x18] sm:$0xff]  ;;  %v49_v8 = vld [vmem:[#allocation6 + $0x20] sm:$0xff]  ;;  %v50_v9 = vld [vmem:[#allocation6 + $0x28] sm:$0xff]  ;;  %42 = vst.msk [vmem:[#allocation2] sm:$0xff] %vm41_vm0, %v330_v27  ;;  %v331_v34 = vmov 0  }
  0x28   :  { %v239_v7 = vpack.c.bf16 %v48_v6, %v47_v4  ;;  %v242_v10 = vpack.c.bf16 %v50_v9, %v49_v8  ;;  %v51_v11 = vld [vmem:[#allocation6 + $0x30] sm:$0xff]  ;;  %v52_v12 = vld [vmem:[#allocation6 + $0x38] sm:$0xff]  ;;  %v53_v14 = vld [vmem:[#allocation6 + $0x40] sm:$0xff]  ;;  %v133_v29 = vand.u32 127, %v132_v28  ;;  %v138_v30 = vshrl.u32 %v132_v28, 7  ;;  %268 = vset.pattern.permute.xlu0 %v331_v34 }
  0x29   :  { %237 = vmatpush3.bf16.msra.mxu0 %v236_v5  ;;  %v245_v13 = vpack.c.bf16 %v52_v12, %v51_v11  ;;  %v54_v15 = vld [vmem:[#allocation6 + $0x48] sm:$0xff]  ;;  %v55_v17 = vld [vmem:[#allocation6 + $0x50] sm:$0xff]  ;;  %v56_v18 = vld [vmem:[#allocation6 + $0x58] sm:$0xff] }
  0x2a   :  { %238 = vmatprep.subr.bf16.mxu0 %v327_v0  ;;  %v248_v16 = vpack.c.bf16 %v54_v15, %v53_v14  ;;  %v251_v19 = vpack.c.bf16 %v56_v18, %v55_v17  ;;  %v57_v20 = vld [vmem:[#allocation6 + $0x60] sm:$0xff]  ;;  %v58_v21 = vld [vmem:[#allocation6 + $0x68] sm:$0xff]  ;;  %v59_v23 = vld [vmem:[#allocation6 + $0x70] sm:$0xff]  ;;  %vm141_vm2 = vcmp.eq.s32.totalorder %v133_v29, %v138_v30  ;;  %vm142_vm3 = vcmp.ge.s32.totalorder %v133_v29, 8 }
  0x2b   :  { %v254_v22 = vpack.c.bf16 %v58_v21, %v57_v20  ;;  %v60_v24 = vld [vmem:[#allocation6 + $0x78] sm:$0xff]  ;;  %vm143_vm4 = vmor %vm141_vm2, %vm142_vm3 }
  0x2c   :  { %v257_v25 = vpack.c.bf16 %v60_v24, %v59_v23  ;;  %v44_v26 = vld [vmem:[#allocation4] sm:$0xff] }
  0x2d   :  { %240 = vmatpush3.bf16.msra.mxu0 %v239_v7  ;;  %v149_v45 = vld [vmem:[#allocation3] sm:$0xff] }
  0x2e   :  { %241 = vmatprep.subr.bf16.mxu0 %v327_v0  ;;  %v147_v35 = vld [vmem:[#allocation2] sm:$0xff] }
  0x31   :  { %243 = vmatpush3.bf16.msra.mxu0 %v242_v10 }
  0x32   :  { %244 = vmatprep.subr.bf16.mxu0 %v327_v0 }
  0x35   :  { %246 = vmatpush3.bf16.msra.mxu0 %v245_v13 }
  0x36   :  { %247 = vmatprep.subr.bf16.mxu0 %v327_v0 }
  0x39   :  { %249 = vmatpush3.bf16.msra.mxu0 %v248_v16 }
  0x3a   :  { %250 = vmatprep.subr.bf16.mxu0 %v327_v0 }
  0x3d   :  { %252 = vmatpush3.bf16.msra.mxu0 %v251_v19 }
  0x3e   :  { %253 = vmatprep.subr.bf16.mxu0 %v327_v0 }
  0x41   :  { %255 = vmatpush3.bf16.msra.mxu0 %v254_v22 }
  0x42   :  { %256 = vmatprep.subr.bf16.mxu0 %v327_v0 }
  0x45   :  { %258 = vmatpush3.bf16.msra.mxu0 %v257_v25 }
  0x48   :  { %233 = vmatmul.mubr.f32.vlgmr.msra.gmra.mrb[0].mxu0 %v44_v26 }
 0x11b   :  { %v127_v31 = vpop.f32.mrb[0].mxu0 }
 0x11c   :  { %v234_v32 = vpop.f32.mrb[1].mxu0  ;;  %v144_v33 = vsel %vm143_vm4, -1e+30, %v127_v31 }
 0x11d   :  { %145 = vmax.xlane.f32.xlu0 %v144_v33 }
 0x1aa   :  { %v146_v36 = vpop.xlane.xlu0 %145 }
 0x1ab   :  { %v148_v37 = vmax.f32 %v147_v35, %v146_v36 }
 0x1ad   :  { %v150_v38 = vsub.f32 %v147_v35, %v148_v37  ;;  %167 = vst.msk [vmem:[#allocation2] sm:$0xff] %vm41_vm0, %v148_v37  ;;  %156 = vperm.xlu0 %268, %v148_v37  }
 0x1af   :  { %v151_v43 = vmul.f32 1.442695, %v150_v38 }
 0x1b4   :  { %v171_v52 = vld [vmem:[#allocation2] sm:$0xff] }
 0x22c   :  { %v157_v39 = vpop.permute.xlu0 %156 }
 0x22d   :  { %v159_v40 = vsub.f32 %v144_v33, %v157_v39 }
 0x22f   :  { %v160_v41 = vmul.f32 1.442695, %v159_v40 }
 0x231   :  { %269 = vpow2.f32 %v160_v41 }
 0x232   :  { %271 = vpow2.f32 %v151_v43 }
 0x23b   :  { %v270_v42 = vpop.eup %269 }
 0x23c   :  { %162 = vadd.xlane.f32.xlu1 %v270_v42  ;;  %v272_v44 = vpop.eup %271 }
 0x23d   :  { %v153_v46 = vmul.f32 %v272_v44, %v149_v45 }
 0x2c9   :  { %v163_v47 = vpop.xlane.xlu1 %162 }
 0x2ca   :  { %v164_v48 = vadd.f32 %v163_v47, %v153_v46 }
 0x2cc   :  { %166 = vst.msk [vmem:[#allocation3] sm:$0xff] %vm41_vm0, %v164_v48 }
 0x2d3   :  { %v172_v49 = vld [vmem:[#allocation3] sm:$0xff] }
 0x2d4   :  { %273 = vlog2.f32 %v172_v49 }
 0x2de   :  { %v274_v50 = vpop.eup %273 }
 0x2df   :  { %v174_v51 = vmul.f32 0.6931472, %v274_v50 }
 0x2e1   :  { %v175_v53 = vadd.f32 %v174_v51, %v171_v52 }
 0x2e3   :  { %176 = vst.msk [vmem:[%s388_s2] sm:$0xff] %vm41_vm0, %v175_v53 }
 0x2e4   :  { %181 = vsyncpa [#allocation5], 1 }
 0x2e5   :  { %182 = vsyncpa [#allocation7], 1 }

</bundles_post_ra>
